<compile_context>
chip_gen: v7x
topology: tpu7x:2x2x1
jax: 0.10.0
libtpu: 0.0.40
codegen_flags: <defaults>
</compile_context>

<pallas_src>
import functools

import jax
import jax.numpy as jnp
from jax.experimental import pallas as pl
from jax.experimental.pallas import tpu as pltpu


def _causal_conv1d_kernel(x_ref, w_ref, b_ref, o_ref, tail_ref, *, K, causal):
    # x_ref    : (B, C_in, Lt)         batch x L tile, PyTorch NCL layout (L on lanes)
    # w_ref    : (K, C_out, C_in)      tap-major weights
    # b_ref    : (C_out, 1)
    # o_ref    : (B, C_out, Lt)
    # tail_ref : (B, C_in, max(K-1,1)) carry: last K-1 timesteps of the previous
    #                                  L tile of this batch block (causal halo)
    B, C_in, Lt = x_ref.shape
    C_out = o_ref.shape[1]
    lt = pl.program_id(1)

    # First L tile of every batch block: the halo is the ConstantPad1d zeros.
    @pl.when(lt == 0)
    def _():
        tail_ref[...] = jnp.zeros_like(tail_ref)

    x = x_ref[...]                                   # (B, C_in, Lt)
    tail = tail_ref[...]                             # (B, C_in, K-1)
    b = b_ref[...]                                   # (C_out, 1)

    # Accumulator initialised with a single, hoisted bias broadcast.
    acc = jnp.broadcast_to(b[None, :, :].astype(jnp.float32), (B, C_out, Lt))

    if K > 1:
        lane = jax.lax.broadcasted_iota(jnp.int32, (B, C_in, Lt), 2)

    # One reused shifted view of x; no materialised im2col.
    xv = x
    for s in range(K):                               # s = right-shift (timesteps)
        k = K - 1 - s                                # tap index
        if s > 0:
            # Shift one timestep to the right (XLU rotate), then insert the
            # halo column from the previous tile / causal zero padding.
            entering = tail[:, :, K - 1 - s]         # (B, C_in)
            xv = pltpu.roll(xv, 1, 2)
            xv = jnp.where(lane == 0, entering[:, :, None], xv)
        if causal and k == K - 1:
            continue                                 # masked tap is exactly zero
        wk = jnp.broadcast_to(w_ref[k][None], (B, C_out, C_in))
        acc = acc + jnp.einsum('boc,bcl->bol', wk, xv,
                               preferred_element_type=jnp.float32)

    o_ref[...] = acc.astype(o_ref.dtype)             # one lane-dense block store

    # Carry the last K-1 timesteps of this tile for the next L tile.
    if K > 1 and Lt >= K - 1:
        tail_ref[...] = x[:, :, Lt - (K - 1):]


def causal_conv1d(x, weight, bias, *, mask_type, block_batch=8, block_l=4096):
    """x: (N, C_in, L) NCL; weight: (C_out, C_in, K); bias: (C_out,)."""
    N, C_in, L = x.shape
    C_out, _, K = weight.shape
    causal = (mask_type == 'causal')

    # Causal masking of the last tap (matches `weight.data[:, :, -1].zero_()`).
    if causal:
        weight = weight.at[:, :, -1].set(0.0)

    # Parameter-side reshapes only (tiny); activations stay NCL in HBM.
    w_k = jnp.transpose(weight, (2, 0, 1))           # (K, C_out, C_in)
    b_col = bias.reshape(C_out, 1)

    # Batch tile ("parallel" -> megacore on v7x) and lane-dense L tile
    # ("arbitrary" -> sequential, carries the K-1 halo in VMEM scratch).
    B = max(1, min(N, block_batch))
    block_l = max(128, (block_l // 128) * 128)       # keep tiles lane-dense
    Lt = L if L <= block_l else block_l
    grid = (pl.cdiv(N, B), pl.cdiv(L, Lt))

    itemsize = jnp.dtype(x.dtype).itemsize
    cost = pl.CostEstimate(
        flops=2 * N * C_out * L * K * C_in,
        transcendentals=0,
        bytes_accessed=itemsize * N * L * (C_in + C_out)
        + weight.size * jnp.dtype(weight.dtype).itemsize
        + bias.size * jnp.dtype(bias.dtype).itemsize,
    )

    kernel = functools.partial(_causal_conv1d_kernel, K=K, causal=causal)
    return pl.pallas_call(
        kernel,
        out_shape=jax.ShapeDtypeStruct((N, C_out, L), x.dtype),
        grid_spec=pltpu.PrefetchScalarGridSpec(
            num_scalar_prefetch=0,
            grid=grid,
            in_specs=[
                pl.BlockSpec((B, C_in, Lt), lambda nb, lt: (nb, 0, lt)),
                pl.BlockSpec((K, C_out, C_in), lambda nb, lt: (0, 0, 0)),
                pl.BlockSpec((C_out, 1), lambda nb, lt: (0, 0)),
            ],
            out_specs=pl.BlockSpec((B, C_out, Lt), lambda nb, lt: (nb, 0, lt)),
            scratch_shapes=[pltpu.VMEM((B, C_in, max(K - 1, 1)), x.dtype)],
        ),
        compiler_params=pltpu.CompilerParams(
            dimension_semantics=("parallel", "arbitrary")),
        cost_estimate=cost,
    )(x, w_k, b_col)


def _reference(x_ncl, weight, bias, mask_type):
    # Pure-JAX reference for sanity checking.
    if mask_type == 'causal':
        weight = weight.at[:, :, -1].set(0.0)
    N, C_in, L = x_ncl.shape
    C_out, _, K = weight.shape
    x_pad = jnp.pad(x_ncl, ((0, 0), (0, 0), (K - 1, 0)))
    out = jnp.zeros((N, C_out, L), dtype=jnp.float32)
    for k in range(K):
        out = out + jnp.einsum('ncl,oc->nol', x_pad[:, :, k:k + L],
                               weight[:, :, k])
    return (out + bias[None, :, None]).astype(x_ncl.dtype)


if __name__ == "__main__":
    # Small shapes consistent with the module: Conv1d(in_chs=4, out_chs=8, K=3).
    N, C_in, C_out, L, K = 2, 4, 8, 16, 3
    mask_type = 'causal'

    key = jax.random.PRNGKey(0)
    kx, kw, kb = jax.random.split(key, 3)
    x = jax.random.normal(kx, (N, C_in, L), dtype=jnp.float32)
    bound = 1.0 / (C_in * K) ** 0.5
    weight = jax.random.uniform(kw, (C_out, C_in, K), jnp.float32, -bound, bound)
    bias = jax.random.uniform(kb, (C_out,), jnp.float32, -bound, bound)

    out = causal_conv1d(x, weight, bias, mask_type=mask_type)
    out = jax.block_until_ready(out)
    ref = _reference(x, weight, bias, mask_type)
    assert out.shape == (N, C_out, L)
    assert jnp.allclose(out, ref, atol=1e-5, rtol=1e-5)

    # Also exercise the L-tiling halo carry (multiple L tiles), a ragged batch
    # tile, and the non-causal path.
    x2 = jax.random.normal(jax.random.PRNGKey(1), (3, C_in, 384), jnp.float32)
    out2 = causal_conv1d(x2, weight, bias, mask_type='full',
                         block_batch=2, block_l=128)
    out2 = jax.block_until_ready(out2)
    ref2 = _reference(x2, weight, bias, 'full')
    assert jnp.allclose(out2, ref2, atol=1e-4, rtol=1e-4)

    print("KERNEL_OK")
</pallas_src>

<mosaic_0001>
module attributes {stable_mosaic.version = 11 : i64} {
  func.func @_causal_conv1d_kernel(%arg0: i32, %arg1: i32, %arg2: memref<2x4x16xf32, #tpu.memory_space<vmem>>, %arg3: memref<3x8x4xf32, #tpu.memory_space<vmem>>, %arg4: memref<8x1xf32, #tpu.memory_space<vmem>>, %arg5: memref<2x8x16xf32, #tpu.memory_space<vmem>>, %arg6: memref<2x4x2xf32, #tpu.memory_space<vmem>>) attributes {dimension_semantics = [#tpu.dimension_semantics<parallel>, #tpu.dimension_semantics<arbitrary>], iteration_bounds = array<i64: 1, 1>, scalar_prefetch = 0 : i64, scratch_operands = 1 : i64, tpu.core_type = #tpu.core_type<tc>, window_params = [{transform_indices = @transform_0, window_bounds = array<i64: 2, 4, 16>}, {pipeline_mode = #tpu.pipeline_mode<synchronous>, transform_indices = @transform_1, window_bounds = array<i64: 3, 8, 4>}, {pipeline_mode = #tpu.pipeline_mode<synchronous>, transform_indices = @transform_2, window_bounds = array<i64: 8, 1>}, {transform_indices = @transform_3, window_bounds = array<i64: 2, 8, 16>}]} {
    %c0_i32 = arith.constant 0 : i32
    %0 = arith.cmpi eq, %arg1, %c0_i32 : i32
    %1 = arith.extui %0 : i1 to i32
    %c0_i32_0 = arith.constant 0 : i32
    %2 = arith.cmpi ne, %1, %c0_i32_0 : i32
    scf.if %2 {
      %cst_23 = arith.constant 0.000000e+00 : f32
      %45 = vector.broadcast %cst_23 : f32 to vector<2x4x2xf32>
      %c0_24 = arith.constant 0 : index
      %c0_25 = arith.constant 0 : index
      %c0_26 = arith.constant 0 : index
      %46 = vector.load %arg6[%c0_24, %c0_25, %c0_26] : memref<2x4x2xf32, #tpu.memory_space<vmem>>, vector<2x4x2xf32>
      tpu.vector_store %arg6[%c0_24, %c0_25, %c0_26], %45 {strides = array<i32>} : memref<2x4x2xf32, #tpu.memory_space<vmem>>, vector<2x4x2xf32>,
    } else {
    }
    %c0 = arith.constant 0 : index
    %c0_1 = arith.constant 0 : index
    %c0_2 = arith.constant 0 : index
    %3 = vector.load %arg2[%c0, %c0_1, %c0_2] : memref<2x4x16xf32, #tpu.memory_space<vmem>>, vector<2x4x16xf32>
    %c0_3 = arith.constant 0 : index
    %c0_4 = arith.constant 0 : index
    %c0_5 = arith.constant 0 : index
    %4 = vector.load %arg6[%c0_3, %c0_4, %c0_5] : memref<2x4x2xf32, #tpu.memory_space<vmem>>, vector<2x4x2xf32>
    %c0_6 = arith.constant 0 : index
    %c0_7 = arith.constant 0 : index
    %5 = vector.load %arg4[%c0_6, %c0_7] : memref<8x1xf32, #tpu.memory_space<vmem>>, vector<8x1xf32>
    %6 = vector.shape_cast %5 : vector<8x1xf32> to vector<1x8x1xf32>
    %7 = vector.shape_cast %6 : vector<1x8x1xf32> to vector<1x8x1xf32>
    %8 = vector.broadcast %7 : vector<1x8x1xf32> to vector<2x8x16xf32>
    %9 = tpu.iota {dimensions = array<i32: 2>} : vector<2x4x16xi32>
    %10 = vector.extract_strided_slice %4 {offsets = [0, 0, 1], sizes = [2, 4, 1], strides = [1, 1, 1]} : vector<2x4x2xf32> to vector<2x4x1xf32>
    %11 = vector.shape_cast %10 : vector<2x4x1xf32> to vector<2x4xf32>
    %c1_i32 = arith.constant 1 : i32
    %12 = tpu.dynamic_rotate %3 by %c1_i32 dim 2 : vector<2x4x16xf32>, i32 -> vector<2x4x16xf32>
    %c0_i32_8 = arith.constant 0 : i32
    %13 = vector.broadcast %c0_i32_8 : i32 to vector<2x4x16xi32>
    %14 = arith.cmpi eq, %9, %13 : vector<2x4x16xi32>
    %15 = vector.shape_cast %11 : vector<2x4xf32> to vector<2x4x1xf32>
    %16 = vector.shape_cast %15 : vector<2x4x1xf32> to vector<2x4x1xf32>
    %17 = vector.broadcast %16 : vector<2x4x1xf32> to vector<2x4x16xf32>
    %18 = arith.select %14, %17, %12 : vector<2x4x16xi1>, vector<2x4x16xf32>
    %c1 = arith.constant 1 : index
    %c0_9 = arith.constant 0 : index
    %c0_10 = arith.constant 0 : index
    %19 = vector.load %arg3[%c1, %c0_9, %c0_10] : memref<3x8x4xf32, #tpu.memory_space<vmem>>, vector<1x8x4xf32>
    %20 = vector.shape_cast %19 : vector<1x8x4xf32> to vector<8x4xf32>
    %21 = vector.shape_cast %20 : vector<8x4xf32> to vector<1x8x4xf32>
    %22 = vector.shape_cast %21 : vector<1x8x4xf32> to vector<1x8x4xf32>
    %23 = vector.broadcast %22 : vector<1x8x4xf32> to vector<2x8x4xf32>
    "tpu.trace_start"() <{level = 10 : i32, message = "boc,bcl->bol"}> : () -> ()
    %cst = arith.constant dense<0.000000e+00> : vector<2x8x16xf32>
    %24 = tpu.matmul %23, %18, %cst {dimension_numbers = #tpu.dot_dimension_numbers<[2], [1], [1], [2], [0, 0, 0, 1, 1, 2], [0], [0]>} : vector<2x8x4xf32>, vector<2x4x16xf32>, vector<2x8x16xf32> -> vector<2x8x16xf32>
    "tpu.trace_stop"() : () -> ()
    %25 = arith.addf %8, %24 : vector<2x8x16xf32>
    %26 = vector.extract_strided_slice %4 {offsets = [0, 0, 0], sizes = [2, 4, 1], strides = [1, 1, 1]} : vector<2x4x2xf32> to vector<2x4x1xf32>
    %27 = vector.shape_cast %26 : vector<2x4x1xf32> to vector<2x4xf32>
    %c1_i32_11 = arith.constant 1 : i32
    %28 = tpu.dynamic_rotate %18 by %c1_i32_11 dim 2 : vector<2x4x16xf32>, i32 -> vector<2x4x16xf32>
    %c0_i32_12 = arith.constant 0 : i32
    %29 = vector.broadcast %c0_i32_12 : i32 to vector<2x4x16xi32>
    %30 = arith.cmpi eq, %9, %29 : vector<2x4x16xi32>
    %31 = vector.shape_cast %27 : vector<2x4xf32> to vector<2x4x1xf32>
    %32 = vector.shape_cast %31 : vector<2x4x1xf32> to vector<2x4x1xf32>
    %33 = vector.broadcast %32 : vector<2x4x1xf32> to vector<2x4x16xf32>
    %34 = arith.select %30, %33, %28 : vector<2x4x16xi1>, vector<2x4x16xf32>
    %c0_13 = arith.constant 0 : index
    %c0_14 = arith.constant 0 : index
    %c0_15 = arith.constant 0 : index
    %35 = vector.load %arg3[%c0_13, %c0_14, %c0_15] : memref<3x8x4xf32, #tpu.memory_space<vmem>>, vector<1x8x4xf32>
    %36 = vector.shape_cast %35 : vector<1x8x4xf32> to vector<8x4xf32>
    %37 = vector.shape_cast %36 : vector<8x4xf32> to vector<1x8x4xf32>
    %38 = vector.shape_cast %37 : vector<1x8x4xf32> to vector<1x8x4xf32>
    %39 = vector.broadcast %38 : vector<1x8x4xf32> to vector<2x8x4xf32>
    "tpu.trace_start"() <{level = 10 : i32, message = "boc,bcl->bol"}> : () -> ()
    %cst_16 = arith.constant dense<0.000000e+00> : vector<2x8x16xf32>
    %40 = tpu.matmul %39, %34, %cst_16 {dimension_numbers = #tpu.dot_dimension_numbers<[2], [1], [1], [2], [0, 0, 0, 1, 1, 2], [0], [0]>} : vector<2x8x4xf32>, vector<2x4x16xf32>, vector<2x8x16xf32> -> vector<2x8x16xf32>
    "tpu.trace_stop"() : () -> ()
    %41 = arith.addf %25, %40 : vector<2x8x16xf32>
    %c0_17 = arith.constant 0 : index
    %c0_18 = arith.constant 0 : index
    %c0_19 = arith.constant 0 : index
    %42 = vector.load %arg5[%c0_17, %c0_18, %c0_19] : memref<2x8x16xf32, #tpu.memory_space<vmem>>, vector<2x8x16xf32>
    tpu.vector_store %arg5[%c0_17, %c0_18, %c0_19], %41 {strides = array<i32>} : memref<2x8x16xf32, #tpu.memory_space<vmem>>, vector<2x8x16xf32>,
    %43 = vector.extract_strided_slice %3 {offsets = [0, 0, 14], sizes = [2, 4, 2], strides = [1, 1, 1]} : vector<2x4x16xf32> to vector<2x4x2xf32>
    %c0_20 = arith.constant 0 : index
    %c0_21 = arith.constant 0 : index
    %c0_22 = arith.constant 0 : index
    %44 = vector.load %arg6[%c0_20, %c0_21, %c0_22] : memref<2x4x2xf32, #tpu.memory_space<vmem>>, vector<2x4x2xf32>
    tpu.vector_store %arg6[%c0_20, %c0_21, %c0_22], %43 {strides = array<i32>} : memref<2x4x2xf32, #tpu.memory_space<vmem>>, vector<2x4x2xf32>,
    return
  }
  func.func @transform_0(%arg0: i32, %arg1: i32) -> (i32, i32, i32) {
    %c0_i32 = arith.constant 0 : i32
    %c0_i32_0 = arith.constant 0 : i32
    return %arg0, %c0_i32, %arg1 : i32, i32, i32
  }
  func.func @transform_1(%arg0: i32, %arg1: i32) -> (i32, i32, i32) {
    %c0_i32 = arith.constant 0 : i32
    %c0_i32_0 = arith.constant 0 : i32
    %c0_i32_1 = arith.constant 0 : i32
    %c0_i32_2 = arith.constant 0 : i32
    return %c0_i32, %c0_i32_0, %c0_i32_1 : i32, i32, i32
  }
  func.func @transform_2(%arg0: i32, %arg1: i32) -> (i32, i32) {
    %c0_i32 = arith.constant 0 : i32
    %c0_i32_0 = arith.constant 0 : i32
    %c0_i32_1 = arith.constant 0 : i32
    return %c0_i32, %c0_i32_0 : i32, i32
  }
  func.func @transform_3(%arg0: i32, %arg1: i32) -> (i32, i32, i32) {
    %c0_i32 = arith.constant 0 : i32
    %c0_i32_0 = arith.constant 0 : i32
    return %arg0, %c0_i32, %arg1 : i32, i32, i32
  }
}

</mosaic_0001>

<bundles_post_ra>
// kernel: tpu_custom_call.1
= control target key start
LH: loop header
LB: loop body
LE: loop exit
PB: predicated region body
PF: predicated region fallthrough
CT: control target
= control target key end

     0   :  { %s516_s14 = smov 16   ;;  %vm19_vm0 = vcmask 11264   ;;  %s621_s0 = inlined_call_operand.vmem [shape: f32[2,4,16], index: 0, kind: input, shape index: {}]   ;;  %s622_s1 = inlined_call_operand.vmem [shape: f32[3,8,4], index: 1, kind: input, shape index: {}]   ;;  %s623_s2 = inlined_call_operand.vmem [shape: f32[8,1], index: 2, kind: input, shape index: {}]   ;;  %s624_s3 = inlined_call_operand.hbm [shape: f32[2,8,16], index: 3, kind: output, shape index: {}]  }
   0x1   :  { %v549_v0 = vld [vmem:[%s621_s0] sm:$0xf] }
   0x2   :  { %35 = vrot.lane.b32.xlu0 %v549_v0, %s516_s14 }
   0x3   :  { %8 = vsyncpa [#allocation4], 0  ;;  %v556_v1 = vld [vmem:[%s621_s0 + $0x4] sm:$0xf]  ;;  %v517_v2 = vmov 1   ;;  %v518_v3 = vmov 0.0   ;;  %v32_v14 = vlaneseq }
   0x4   :  { %489 = vset.pattern.permute.xlu1 %v517_v2  ;;  %21 = vst.msk [vmem:[#allocation2 + $0x4] sm:$0xf] %vm19_vm0, %v518_v3  ;;  %20 = vst.msk [vmem:[#allocation2] sm:$0xf] %vm19_vm0, %v518_v3  ;;  %488 = vset.pattern.permute.xlu0 %v517_v2  ;;  %vm34_vm1 = vcmask 1047680   ;;  %s519_s0 = smov 113  }
   0x5   :  { %452 = vmatprep.subr.mxu0 %v518_v3  ;;  %457 = vmatprep.subr.mxu1 %v518_v3  ;;  %v33_v16 = vand.u32 127, %v32_v14  ;;  %v520_v17 = vmov 0   ;;  %vm74_vm3 = vcmask 1043456   ;;  %v435_v23 = vld [vmem:[%s622_s1 + $0x8] sm:$0xff]  ;;  %vm70_vm4 = vcmask 31744   ;;  %v26_v28 = vld [vmem:[%s623_s2] sm:$0xff] }
   0x6   :  { %38 = vrot.lane.b32.xlu0 %v556_v1, %s516_s14  ;;  %vm521_vm5 = vmmov 0   ;;  %s522_s21 = smov 114   ;;  %v253_v35 = vld [vmem:[%s622_s1] sm:$0xff]  ;;  %vm405_vm6 = vcmask 130048   ;;  %s523_s1 = smov [#allocation3]  }
   0x7   :  { %vm47_vm2 = vcmp.eq.s32.totalorder %v33_v16, 0  ;;  %454 = vmatprep.mubr.msk.f32.mxu0 %vm521_vm5, %v518_v3  ;;  %459 = vmatprep.mubr.msk.f32.mxu1 %vm521_vm5, %v518_v3  ;;  %s424_s23 = sshll.u32 %s523_s1, 4  ;;  %s425_s23 = int_to_ptr.vmem [resolvable:$true] %s424_s23 }
   0x8   :  { %s492_s24 = scalar_lea.vmem %s425_s23, 256  ;;  %p497_p1 = scmp.lt.s32.totalorder %s425_s23, %s425_s23 }
   0x9   :  { %p493_p0 = scmp.ne.s32.totalorder %s425_s23, %s492_s24  ;;  %p498_p2 = scmp.lt.s32.totalorder %s492_s24, %s492_s24 }
   0xb   :  { %v24_v4 = vld [vmem:[#allocation2] sm:$0xf]  ;;  %v25_v9 = vld [vmem:[#allocation2 + $0x4] sm:$0xf]  ;;  %p499_p3 = por %p498_p2, %p497_p1 }
   0xc   :  { %50 = vperm.xlu0 %488, %v24_v4  }
   0xd   :  { %p500_p4 = pnand %p499_p3, %p493_p0 }
  0x10   :  { %491 = vset.pattern.permute.xlu0 %v520_v17 }
  0x74   :  { %v36_v5 = vpop.permute.xlu0 %35 }
  0x75   :  { %v37_v6 = vsel %vm34_vm1, %v36_v5, %v549_v0 }
  0x76   :  { %41 = vrot.lane.b32.xlu1 %v37_v6, %s516_s14 }
  0x78   :  { %v39_v7 = vpop.permute.xlu0 %38 }
  0x79   :  { %v40_v8 = vsel %vm34_vm1, %v39_v7, %v556_v1 }
  0x7a   :  { %43 = vrot.lane.b32.xlu1 %v40_v8, %s516_s14 }
  0x7e   :  { %55 = vperm.xlu1 %489, %v25_v9  }
  0x82   :  { %490 = vset.pattern.permute.xlu1 %v520_v17 }
  0x8b   :  { %v51_v18 = vpop.permute.xlu0 %50 }
  0xe8   :  { %v42_v10 = vpop.permute.xlu1 %41 }
  0xe9   :  { %v45_v11 = vsel %vm34_vm1, %v42_v10, %v549_v0 }
  0xea   :  { %60 = vrot.lane.b32.xlu1 %v45_v11, %s519_s0 }
  0xec   :  { %v44_v12 = vpop.permute.xlu1 %43 }
  0xed   :  { %v46_v13 = vsel %vm34_vm1, %v44_v12, %v556_v1 }
  0xee   :  { %62 = vrot.lane.b32.xlu0 %v46_v13, %s519_s0 }
  0xfd   :  { %v56_v15 = vpop.permute.xlu1 %55 }
 0x15c   :  { %v61_v19 = vpop.permute.xlu1 %60 }
 0x15d   :  { %v66_v20 = vsel %vm47_vm2, %v51_v18, %v61_v19 }
 0x15e   :  { %223 = vrot.lane.b32.xlu1 %v66_v20, %s516_s14  ;;  %453 = vmatpush3.msk.msra.mxu0 %vm74_vm3, %v66_v20 }
 0x15f   :  { %462 = vmatprep.subr.mxu0 %v518_v3  ;;  %455 = vmatmul.mubr.msk.f32.vlgmr.msra.gmra.mrb[0].mxu0 %vm70_vm4, %v435_v23 }
 0x160   :  { %v63_v21 = vpop.permute.xlu0 %62  ;;  %464 = vmatprep.mubr.msk.f32.mxu0 %vm521_vm5, %v518_v3 }
 0x161   :  { %v67_v22 = vsel %vm47_vm2, %v56_v15, %v63_v21 }
 0x162   :  { %226 = vrot.lane.b32.xlu0 %v67_v22, %s516_s14  ;;  %458 = vmatpush3.msk.msra.mxu1 %vm74_vm3, %v67_v22 }
 0x163   :  { %467 = vmatprep.subr.mxu1 %v518_v3  ;;  %460 = vmatmul.mubr.msk.f32.vlgmr.msra.gmra.mrb[0].mxu1 %vm70_vm4, %v435_v23 }
 0x164   :  { %469 = vmatprep.mubr.msk.f32.mxu1 %vm521_vm5, %v518_v3 }
 0x1d0   :  { %v224_v24 = vpop.permute.xlu1 %223 }
 0x1d1   :  { %v225_v25 = vsel %vm34_vm1, %v224_v24, %v66_v20 }
 0x1d2   :  { %229 = vrot.lane.b32.xlu1 %v225_v25, %s516_s14 }
 0x1d4   :  { %v227_v26 = vpop.permute.xlu0 %226 }
 0x1d5   :  { %v228_v27 = vsel %vm34_vm1, %v227_v26, %v67_v22 }
 0x1d6   :  { %231 = vrot.lane.b32.xlu0 %v228_v27, %s516_s14  ;;  %236 = vperm.xlu1 %490, %v24_v4  }
 0x1da   :  { %240 = vperm.xlu0 %491, %v25_v9  }
 0x1de   :  { %29 = vperm.xlu0 %491, %v26_v28  }
 0x1e2   :  { %412 = vrot.lane.b32.xlu0 %v556_v1, %s522_s21 }
 0x244   :  { %v230_v29 = vpop.permute.xlu1 %229 }
 0x245   :  { %v233_v30 = vsel %vm34_vm1, %v230_v29, %v66_v20 }
 0x246   :  { %245 = vrot.lane.b32.xlu1 %v233_v30, %s519_s0 }
 0x248   :  { %v232_v31 = vpop.permute.xlu0 %231 }
 0x249   :  { %v234_v32 = vsel %vm34_vm1, %v232_v31, %v67_v22 }
 0x24a   :  { %247 = vrot.lane.b32.xlu1 %v234_v32, %s519_s0 }
 0x24e   :  { %410 = vrot.lane.b32.xlu1 %v549_v0, %s522_s21 }
 0x255   :  { %v237_v33 = vpop.permute.xlu1 %236 }
 0x259   :  { %v241_v37 = vpop.permute.xlu0 %240 }
 0x25d   :  { %v30_v40 = vpop.permute.xlu0 %29 }
 0x261   :  { %v413_v42 = vpop.permute.xlu0 %412 }
 0x262   :  { %418 = vst.msk [vmem:[#allocation2 + $0x4] sm:$0xf] %vm19_vm0, %v413_v42 }
 0x2b8   :  { %v246_v34 = vpop.permute.xlu1 %245 }
 0x2b9   :  { %v251_v36 = vsel %vm47_vm2, %v237_v33, %v246_v34 }
 0x2ba   :  { %463 = vmatpush3.msk.msra.mxu0 %vm74_vm3, %v251_v36 }
 0x2bb   :  { %465 = vmatmul.mubr.msk.f32.vlgmr.msra.gmra.mrb[0].mxu0 %vm70_vm4, %v253_v35 }
 0x2bc   :  { %v248_v38 = vpop.permute.xlu1 %247 }
 0x2bd   :  { %v252_v39 = vsel %vm47_vm2, %v241_v37, %v248_v38 }
 0x2be   :  { %468 = vmatpush3.msk.msra.mxu1 %vm74_vm3, %v252_v39 }
 0x2bf   :  { %470 = vmatmul.mubr.msk.f32.vlgmr.msra.gmra.mrb[0].mxu1 %vm70_vm4, %v253_v35 }
 0x2c0   :  { %v411_v41 = vpop.permute.xlu1 %410 }
 0x2c1   :  { %417 = vst.msk [vmem:[#allocation2] sm:$0xf] %vm19_vm0, %v411_v41 }
 0x38e   :  { %v326_v43 = vpop.f32.mrb[0].mxu0 }
 0x38f   :  { %v472_v44 = vadd.f32 %v326_v43, %v30_v40  ;;  %v466_v45 = vpop.f32.mrb[1].mxu0 }
 0x391   :  { %406 = vst.msk [vmem:[#allocation3] sm:$0xff] %vm405_vm6, %v472_v44 }
 0x392   :  { %v399_v46 = vpop.f32.mrb[0].mxu1 }
 0x393   :  { %v473_v47 = vadd.f32 %v399_v46, %v30_v40  ;;  %v471_v48 = vpop.f32.mrb[1].mxu1 }
 0x395   :  { %407 = vst.msk [vmem:[#allocation3 + $0x8] sm:$0xff] %vm405_vm6, %v473_v47 }
 0x396   :  { %503 = shalt.err (!%p500_p4)
}
 0x397   :  { %s504_s27 = scalar_lea.hbm %s624_s3, 256 }
 0x398   :  { %p505_p5 = scmp.ne.s32.totalorder %s624_s3, %s504_s27  ;;  %p508_p6 = scmp.lt.u32.totalorder %s504_s27, %s624_s3 }
 0x39a   :  { %p510_p7 = pnand %p508_p6, %p505_p5 }
 0x39c   :  { %513 = shalt.err (!%p510_p7)
}
 0x39d   :  { %s524_s5 = smov 128   ;;  %s525_s6 = smov 8  }
 0x39e   :  { %430 = dma.vmem_to_hbm [thread:$0]  %s425_s23, 256, %s624_s3, [#allocation4], %s524_s5, %s524_s5, %s525_s6  }
 0x39f   :  { %514 = dma.done.wait [#allocation4], 256  }
 0x3a0   :  { %515 = vsyncadd [#allocation4], 4294967040 }
 0x3a1   :  { %434 = vsyncpa [#allocation4], 1 }

</bundles_post_ra>
